<compile_context>
chip_gen: v7x
topology: tpu7x:2x2x1
jax: 0.10.0
libtpu: 0.0.40
codegen_flags: <defaults>
</compile_context>

<pallas_src>
import jax
import jax.numpy as jnp
from jax.experimental import pallas as pl
from jax.experimental.pallas import tpu as pltpu


_MULTICORE_BYTES = 1 << 20        # prefer >= 2 row tiles above this much selected input


def _vmem_capacity_bytes():
    try:
        return int(pltpu.get_tpu_info().vmem_capacity_bytes)
    except Exception:
        return 64 * 1024 * 1024   # conservative (v7x per-TC VMEM); safe everywhere


def _divisors(n):
    out, d = [], 1
    while d * d <= n:
        if n % d == 0:
            out.append(d)
            if d != n // d:
                out.append(n // d)
        d += 1
    return sorted(out)


def _plan_exact(total, itemsize, needs_scratch, block_budget, min_tiles):
    """Tile `total` elements as (num_tiles*Rb, L) with R*L == total exactly
    (no padding).  Returns (R, L, Rb, num_tiles) or None if impossible."""
    per_elem = 4 * itemsize + (4 if needs_scratch else 0)   # 2x in + 2x out (+ f32 scratch)
    lanes = (1024, 512, 256, 128)
    # Preferred: a flattening whose row count is a multiple of 8, so row tiles
    # can divide it exactly with (8,128)-aligned blocks.
    for L in lanes:
        if total % L == 0 and (total // L) % 8 == 0:
            R = total // L
            max_rows = max(8, (block_budget // (per_elem * L)) // 8 * 8)
            units = R // 8
            need = -(-R // max_rows)                         # hard VMEM requirement
            want = min(max(need, min_tiles), units)          # soft megacore preference
            divs = [d for d in _divisors(units) if d >= want]
            nt = divs[0]
            if nt > 1 and nt % 2:                            # prefer even (2-TC balance)
                evens = [d for d in divs if d % 2 == 0]
                if evens and evens[0] <= 2 * nt:
                    nt = evens[0]
            return R, L, R // nt, nt
    # Fallback within the no-pad regime: one full-extent tile (block == full
    # dims, so the (8,128) rule does not apply) if it fits the VMEM budget.
    for L in lanes:
        if total % L == 0:
            R = total // L
            if R * L * per_elem <= block_budget:
                return R, L, R, 1
    return None


def _plan_padded(total, itemsize, needs_scratch, block_budget, min_tiles):
    """Ragged case (total not a multiple of 128, or too big for a single
    unaligned tile): caller gathers only the selected candidates and pads
    those.  Returns (R, L, Rb, num_tiles) with R*L >= total."""
    per_elem = 4 * itemsize + (4 if needs_scratch else 0)
    L = 512 if total >= 512 else 128
    max_rows = max(8, (block_budget // (per_elem * L)) // 8 * 8)
    r_raw = -(-total // L)
    nt = max(-(-r_raw // max_rows), min_tiles if r_raw >= 16 else 1)
    if nt == 1:
        return r_raw, L, r_raw, 1
    rb = ((-(-r_raw // nt) + 7) // 8) * 8
    return nt * rb, L, rb, nt


def _make_kernel(scale, use_scratch):
    """grid = (row_tiles, n_chosen); candidate (reduction) axis last."""
    if use_scratch:
        # Low-precision input: accumulate in an f32 VMEM scratch, cast once.
        def kernel(sel_ref, x_ref, o_ref, acc_ref):
            k = pl.program_id(1)

            @pl.when(k == 0)
            def _():                      # first selected candidate: no zero-init pass
                acc_ref[...] = x_ref[...].astype(jnp.float32)

            @pl.when(k > 0)
            def _():
                acc_ref[...] += x_ref[...].astype(jnp.float32)

            @pl.when(k == pl.num_programs(1) - 1)
            def _():
                out = acc_ref[...]
                if scale != 1.0:          # fold reduction='mean' into the epilogue
                    out = out * scale
                o_ref[...] = out.astype(o_ref.dtype)
    else:
        # float32 input: accumulate directly in the resident output block
        # (its index_map ignores k) - no scratch, no epilogue copy.
        def kernel(sel_ref, x_ref, o_ref):
            k = pl.program_id(1)

            @pl.when(k == 0)
            def _():
                o_ref[...] = x_ref[...]

            @pl.when(k > 0)
            def _():
                o_ref[...] += x_ref[...]

            if scale != 1.0:
                @pl.when(k == pl.num_programs(1) - 1)
                def _():
                    o_ref[...] = o_ref[...] * scale
    return kernel


def input_choice_forward(candidates, mask, n_chosen, reduction="sum",
                         return_mask=False, block_budget_bytes=None):
    """Pallas implementation of InputChoice.forward.

    candidates : (n_candidates, ...) stacked optional_input_list (or a list/tuple)
    mask       : (n_candidates,) 0/1 selection produced by the mutator
    n_chosen   : static number of selected candidates (== mask.sum())
    """
    if isinstance(candidates, (list, tuple)):
        candidates = jnp.stack(candidates)
    if reduction not in ("sum", "mean"):
        # TODO(synk): reduction='concat'/'none' return a concatenation / list of
        # the selected tensors (no single-tensor reduction); not kernelized.
        raise NotImplementedError(f"reduction={reduction!r} is not kernelized")

    n_cand = candidates.shape[0]
    inner_shape = candidates.shape[1:]
    dtype = candidates.dtype
    itemsize = jnp.dtype(dtype).itemsize
    total = 1
    for d in inner_shape:
        total *= int(d)

    if n_chosen == 0:
        out = jnp.zeros(inner_shape, dtype)
        return (out, mask) if return_mask else out

    # Guard the silent-miscount failure mode of fixed-size nonzero: when the
    # mask is concrete, verify it selects exactly n_chosen candidates.
    try:
        n_set = int(jnp.count_nonzero(mask))
    except jax.errors.ConcretizationTypeError:
        n_set = None     # traced mask: caller owns the mask.sum() == n_chosen invariant
    if n_set is not None and n_set != n_chosen:
        raise ValueError(f"mask selects {n_set} candidates, expected n_chosen={n_chosen}")

    scale = (1.0 / n_chosen) if reduction == "mean" else 1.0
    use_scratch = dtype != jnp.float32   # f32 accumulates directly into the output block

    # Compacted selected-candidate indices (scalar-prefetched into SMEM):
    # only these candidates are ever DMA'd from HBM by the kernel.
    sel = jnp.nonzero(mask != 0, size=n_chosen, fill_value=0)[0].astype(jnp.int32)

    if block_budget_bytes is None:
        block_budget_bytes = min(_vmem_capacity_bytes() // 2, 48 * 1024 * 1024)
    min_tiles = 2 if n_chosen * total * itemsize >= _MULTICORE_BYTES else 1

    plan = _plan_exact(total, itemsize, use_scratch, block_budget_bytes, min_tiles)
    if plan is not None:
        R, L, Rb, num_tiles = plan
        x = candidates.reshape(n_cand, R, L)         # pure reshape: no HBM copy / pad
        padded = False
    else:
        # Ragged tail: gather only the n_chosen selected candidates, pad those.
        R, L, Rb, num_tiles = _plan_padded(total, itemsize, use_scratch,
                                           block_budget_bytes, min_tiles)
        x = candidates.reshape(n_cand, total)[sel]
        x = jnp.pad(x, ((0, 0), (0, R * L - total))).reshape(n_chosen, R, L)
        sel = jnp.arange(n_chosen, dtype=jnp.int32)
        padded = True

    # Actual VMEM use: double-buffered input + double-buffered output (+ scratch).
    block_bytes = Rb * L * itemsize
    vmem_usage = 4 * block_bytes + (Rb * L * 4 if use_scratch else 0)
    vmem_cap = _vmem_capacity_bytes()
    vmem_limit = int(min(max(vmem_usage + (2 << 20), 32 << 20),
                         max(vmem_cap - (4 << 20), 32 << 20)))

    scratch = [pltpu.VMEM((Rb, L), jnp.float32)] if use_scratch else []

    out_flat = pl.pallas_call(
        _make_kernel(scale, use_scratch),
        out_shape=jax.ShapeDtypeStruct((R, L), dtype),
        grid_spec=pltpu.PrefetchScalarGridSpec(
            num_scalar_prefetch=1,
            grid=(num_tiles, n_chosen),                            # reduction axis last
            in_specs=[pl.BlockSpec((pl.Squeezed(), Rb, L),
                                   lambda i, k, s: (s[k], i, 0))],  # selected only
            out_specs=pl.BlockSpec((Rb, L), lambda i, k, s: (i, 0)),
            scratch_shapes=scratch,
        ),
        compiler_params=pltpu.CompilerParams(
            dimension_semantics=("parallel", "arbitrary"),
            vmem_limit_bytes=vmem_limit,
        ),
    )(sel, x)

    if padded:
        out = out_flat.reshape(R * L)[:total].reshape(inner_shape)
    else:
        out = out_flat.reshape(inner_shape)
    if return_mask:
        return out, mask
    return out


if __name__ == "__main__":
    key = jax.random.PRNGKey(0)
    k1, k2, k3 = jax.random.split(key, 3)

    # InputChoice(n_candidates=4, n_chosen=2, reduction='sum', return_mask=True)
    n_candidates, n_chosen = 4, 2
    N, C, H, W = 2, 4, 16, 16

    candidates = jax.random.normal(k1, (n_candidates, N, C, H, W), dtype=jnp.float32)
    mask = jnp.array([1, 0, 1, 0], dtype=jnp.int32)   # mutator chose candidates 0 and 2
    assert int(mask.sum()) == n_chosen

    ref = jnp.einsum("k,knchw->nchw", mask.astype(jnp.float32), candidates)

    out, out_mask = input_choice_forward(candidates, mask, n_chosen,
                                         reduction="sum", return_mask=True)
    out = jax.block_until_ready(out)
    assert out.shape == (N, C, H, W)
    assert jnp.allclose(out, ref, atol=1e-5, rtol=1e-5)

    # reduction='mean': scale folded into the kernel epilogue.
    out_mean = jax.block_until_ready(
        input_choice_forward(candidates, mask, n_chosen, reduction="mean"))
    assert jnp.allclose(out_mean, ref / n_chosen, atol=1e-5, rtol=1e-5)

    # Larger input: multi-row-tile path (num_tiles >= 2, 'parallel' axis
    # shardable across v7x's two TensorCores), no padding, no scratch (f32).
    big = jax.random.normal(k2, (n_candidates, 4, 8, 128, 128), dtype=jnp.float32)
    big_mask = jnp.array([0, 1, 0, 1], dtype=jnp.int32)
    big_ref = jnp.einsum("k,kbchw->bchw", big_mask.astype(jnp.float32), big)
    big_out = jax.block_until_ready(
        input_choice_forward(big, big_mask, n_chosen, reduction="sum"))
    assert jnp.allclose(big_out, big_ref, atol=1e-4, rtol=1e-4)

    # bf16 input: f32 VMEM accumulator path.
    cand_bf16 = candidates.astype(jnp.bfloat16)
    bf16_ref = jnp.einsum("k,knchw->nchw", mask.astype(jnp.float32),
                          cand_bf16.astype(jnp.float32)).astype(jnp.bfloat16)
    bf16_out = jax.block_until_ready(
        input_choice_forward(cand_bf16, mask, n_chosen, reduction="sum"))
    assert jnp.allclose(bf16_out.astype(jnp.float32), bf16_ref.astype(jnp.float32),
                        atol=1e-2, rtol=1e-2)

    # Ragged total (not a multiple of 128): selected-only gather+pad fallback.
    rag = jax.random.normal(k3, (3, 5, 7, 9), dtype=jnp.float32)
    rag_mask = jnp.array([0, 1, 1], dtype=jnp.int32)
    rag_ref = rag[1] + rag[2]
    rag_out = jax.block_until_ready(
        input_choice_forward(rag, rag_mask, 2, reduction="sum"))
    assert jnp.allclose(rag_out, rag_ref, atol=1e-5, rtol=1e-5)

    print("KERNEL_OK")
</pallas_src>

<mosaic_0001>
module attributes {stable_mosaic.version = 11 : i64} {
  func.func @kernel(%arg0: i32, %arg1: i32, %arg2: memref<2xi32, #tpu.memory_space<smem>>, %arg3: memref<1x8x256xf32, #tpu.memory_space<vmem>>, %arg4: memref<8x256xf32, #tpu.memory_space<vmem>>) attributes {dimension_semantics = [#tpu.dimension_semantics<parallel>, #tpu.dimension_semantics<arbitrary>], iteration_bounds = array<i64: 1, 2>, scalar_prefetch = 1 : i64, scratch_operands = 0 : i64, tpu.core_type = #tpu.core_type<tc>, window_params = [{transform_indices = @transform_0, window_bounds = array<i64: 1, 8, 256>}, {transform_indices = @transform_1, window_bounds = array<i64: 8, 256>}]} {
    %c0_i32 = arith.constant 0 : i32
    %0 = arith.cmpi eq, %arg1, %c0_i32 : i32
    %1 = arith.extui %0 : i1 to i32
    %c0_i32_0 = arith.constant 0 : i32
    %2 = arith.cmpi ne, %1, %c0_i32_0 : i32
    scf.if %2 {
      %c0 = arith.constant 0 : index
      %c0_3 = arith.constant 0 : index
      %c0_4 = arith.constant 0 : index
      %6 = vector.load %arg3[%c0, %c0_3, %c0_4] : memref<1x8x256xf32, #tpu.memory_space<vmem>>, vector<1x8x256xf32>
      %7 = vector.shape_cast %6 : vector<1x8x256xf32> to vector<8x256xf32>
      %c0_5 = arith.constant 0 : index
      %c0_6 = arith.constant 0 : index
      %8 = vector.load %arg4[%c0_5, %c0_6] : memref<8x256xf32, #tpu.memory_space<vmem>>, vector<8x256xf32>
      tpu.vector_store %arg4[%c0_5, %c0_6], %7 {strides = array<i32>} : memref<8x256xf32, #tpu.memory_space<vmem>>, vector<8x256xf32>,
    } else {
    }
    %c0_i32_1 = arith.constant 0 : i32
    %3 = arith.cmpi sgt, %arg1, %c0_i32_1 : i32
    %4 = arith.extui %3 : i1 to i32
    %c0_i32_2 = arith.constant 0 : i32
    %5 = arith.cmpi ne, %4, %c0_i32_2 : i32
    scf.if %5 {
      %c0 = arith.constant 0 : index
      %c0_3 = arith.constant 0 : index
      %6 = vector.load %arg4[%c0, %c0_3] : memref<8x256xf32, #tpu.memory_space<vmem>>, vector<8x256xf32>
      %c0_4 = arith.constant 0 : index
      %c0_5 = arith.constant 0 : index
      %c0_6 = arith.constant 0 : index
      %7 = vector.load %arg3[%c0_4, %c0_5, %c0_6] : memref<1x8x256xf32, #tpu.memory_space<vmem>>, vector<1x8x256xf32>
      %8 = vector.shape_cast %7 : vector<1x8x256xf32> to vector<8x256xf32>
      %9 = arith.addf %6, %8 : vector<8x256xf32>
      %c0_7 = arith.constant 0 : index
      %c0_8 = arith.constant 0 : index
      %10 = vector.load %arg4[%c0_7, %c0_8] : memref<8x256xf32, #tpu.memory_space<vmem>>, vector<8x256xf32>
      tpu.vector_store %arg4[%c0_7, %c0_8], %9 {strides = array<i32>} : memref<8x256xf32, #tpu.memory_space<vmem>>, vector<8x256xf32>,
    } else {
    }
    return
  }
  func.func @transform_0(%arg0: i32, %arg1: i32, %arg2: memref<2xi32, #tpu.memory_space<smem>>) -> (i32, i32, i32) {
    %0 = arith.index_cast %arg1 : i32 to index
    %1 = memref.load %arg2[%0] : memref<2xi32, #tpu.memory_space<smem>>
    %c0_i32 = arith.constant 0 : i32
    %c0_i32_0 = arith.constant 0 : i32
    return %1, %arg0, %c0_i32 : i32, i32, i32
  }
  func.func @transform_1(%arg0: i32, %arg1: i32, %arg2: memref<2xi32, #tpu.memory_space<smem>>) -> (i32, i32) {
    %c0_i32 = arith.constant 0 : i32
    %c0_i32_0 = arith.constant 0 : i32
    return %arg0, %c0_i32 : i32, i32
  }
}

</mosaic_0001>

<bundles_post_ra>
// kernel: tpu_custom_call.1
= control target key start
LH: loop header
LB: loop body
LE: loop exit
PB: predicated region body
PF: predicated region fallthrough
CT: control target
= control target key end

     0   :  { %s629_s0 = inlined_call_operand.hbm [shape: s32[2], index: 0, kind: input, shape index: {}]   ;;  %s630_s1 = inlined_call_operand.hbm [shape: f32[4,8,256], index: 1, kind: input, shape index: {}]   ;;  %s631_s2 = inlined_call_operand.hbm [shape: f32[8,256], index: 2, kind: output, shape index: {}]  }
   0x1   :  { %s327_s11 = scalar_lea.hbm %s629_s0, 16 }
   0x2   :  { %p328_p0 = scmp.ne.s32.totalorder %s629_s0, %s327_s11  ;;  %p331_p1 = scmp.lt.u32.totalorder %s327_s11, %s629_s0 }
   0x4   :  { %p333_p2 = pnand %p331_p1, %p328_p0 }
   0x6   :  { %336 = shalt.err (!%p333_p2)  }
   0x7   :  { %s451_s16 = smov [#allocation3]  }
   0x8   :  { %8 = dma.hbm_to_smem %s629_s0, 16, %s451_s16, [#allocation2] }
   0x9   :  { %417 = dma.done.wait [#allocation2], 16 }
   0xa   :  { %418 = vsyncadd [#allocation2], 4294967280 }
   0xb   :  { %10 = sfence }
   0xc   :  { %11 = vsyncpa [#allocation5], 0 }
   0xd   :  { %13 = vsyncpa [#allocation5 + $0x1], 0 }
   0xe   :  { %14 = vsyncpa [#allocation6], 0  ;;  %s481_s19 = smov 0   ;;  %s483_s20 = smov 0  }
   0xf   :  { %s485_s21 = smov 0   ;;  %s487_s22 = smov 0  }
  0x10   :  { %s489_s23 = smov 0   ;;  %s491_s24 = smov 0  }
  0x11 LB: > { %s29_s0 = sadd.s32 1, %s445_s23  ;;  %s245_s25 = sadd.s32 4294967295, %s449_s24   ;;  %s449_s24 = sphi %s491_s24, %s20_s24   ;;  %s445_s23 = sphi %s489_s23, %s642_s23   ;;  %s441_s22 = sphi %s487_s22, %s641_s22   ;;  %s437_s21 = sphi %s485_s21, %s640_s21   ;;  %s433_s20 = sphi %s483_s20, %s639_s20   ;;  %s429_s19 = sphi %s481_s19, %s638_s19  }
  0x12   : > { %p30_p3 = scmp.ge.s32.totalorder %s29_s0, 2  ;;  %s36_s26 = sld [smem:[#allocation3 + %s445_s23]] }
  0x13   : > { %p50_p4 = scmp.ne.s32.totalorder %s437_s21, %s433_s20  ;;  %p51_p5 = scmp.eq.s32.totalorder %s449_s24, 0 }
  0x14   : > { %s644_s0 = smov (%p30_p3, %s29_s0), 0  ;;  %p56_p6 = scmp.ne.s32.totalorder %s433_s20, %s429_s19 }
  0x15   : > { %s37_s27 = sld [smem:[#allocation3 + %s644_s0]]  ;;  %p57_p7 = scmp.eq.s32.totalorder %s245_s25, 0 }
  0x16   : > { %s43_s29 = sadd.s32 1, %s437_s21  ;;  %s106_s30 = sand.u32 1, %s437_s21  }
  0x17   : > { %p521_p8 = por %p57_p7, %p56_p6  ;;  %p52_p9 = por %p51_p5, %p50_p4 }
  0x18   : > { %s248_s3 = sshll.u32 %s106_s30, 4  ;;  %p274_p10 = scmp.lt.s32.totalorder %s449_s24, 2 }
  0x19   : > { %s633_s28 = scalar_select %p521_p8, 1, 0 }
  0x1a   : > { %p251_p11 = scmp.ge.s32.totalorder %s449_s24, 1  ;;  %p529_p13 = pnand %p274_p10, %p52_p9 }
  0x1b   : > { %s38_s4 = ssub.s32 %s36_s26, %s37_s27  ;;  %p126_p0 = scmp.lt.s32.totalorder %s449_s24, 3 }
  0x1c   : > { %p41_p12 = scmp.eq.s32.totalorder %s38_s4, 0  ;;  %s110_s11 = scalar_lea.vmem [#allocation4], %s248_s3 }
  0x1d   : > { %s260_s6 = scalar_select %p52_p9, [#allocation3], [#allocation8] }
  0x1e   : > { %s534_s7 = scalar_select %p41_p12, %s437_s21, %s43_s29  }
  0x1f   : > { %s261_s8 = scalar_select %p52_p9, %s445_s23, 0 }
  0x20   : > { %s646_s6 = smov (!%p274_p10, %s260_s6), [#allocation9]  ;;  %p538_p1 = pnand %p251_p11, %p126_p0 }
  0x21   : > { %s648_s8 = smov (!%p274_p10, %s261_s8), 0  ;;  %s121_s12 = sshll.u32 %s110_s11, 4  ;;  %s542_s12 = int_to_ptr.vmem [resolvable:$true] %s121_s12 }
  0x22   : > { %s111_s9 = sld [smem:[%s646_s6 + %s648_s8]]  ;;  %s107_s17 = scalar_lea.sflag [#allocation5], %s106_s30 }
  0x23   : > { %p339_p3 = pneg %p529_p13  ;;  %s342_s27 = scalar_lea.hbm %s630_s1, 1024 }
  0x28   : > { %s259_s13 = sshll.u32 %s111_s9, 8 }
  0x29   : > { %s547_s16 = scalar_lea.hbm %s630_s1, %s259_s13 }
  0x2a   : > { %s337_s18 = scalar_lea.hbm %s547_s16, 256  ;;  %p343_p6 = scmp.lt.u32.totalorder %s547_s16, %s630_s1 }
  0x2b   : > { %p338_p2 = scmp.ne.s32.totalorder %s547_s16, %s337_s18  ;;  %p344_p7 = scmp.lt.u32.totalorder %s342_s27, %s337_s18 }
  0x2c   : > { %p346_p10 = scmp.lt.u32.totalorder %s337_s18, %s547_s16 }
  0x2d   : > { %p340_p4 = pnand %p339_p3, %p338_p2  ;;  %p345_p9 = por %p344_p7, %p343_p6 }
  0x2f   : > { %p341_p5 = pneg %p340_p4  ;;  %p347_p11 = por %p346_p10, %p345_p9 }
  0x31   : > { %p348_p12 = pnand %p347_p11, %p341_p5 }
  0x33   : > { %351 = shalt.err (!%p348_p12)
}
  0x34   : > { %s352_s30 = scalar_lea.vmem %s542_s12, 256  ;;  %s452_s4 = smov [#allocation4]  }
  0x35   : > { %p353_p0 = scmp.ne.s32.totalorder %s542_s12, %s352_s30  ;;  %s357_s6 = sshll.u32 %s452_s4, 4  ;;  %s358_s6 = int_to_ptr.vmem [resolvable:$false] %s357_s6 }
  0x36   : > { %s359_s8 = scalar_lea.vmem %s358_s6, 512  ;;  %p360_p8 = scmp.lt.s32.totalorder %s542_s12, %s358_s6 }
  0x37   : > { %p355_p2 = pnand %p353_p0, %p339_p3  ;;  %p361_p6 = scmp.lt.s32.totalorder %s359_s8, %s352_s30 }
  0x39   : > { %p356_p4 = pneg %p355_p2  ;;  %p362_p7 = por %p361_p6, %p360_p8 }
  0x3b   : > { %p363_p9 = pnand %p362_p7, %p356_p4 }
  0x3d   : > { %366 = shalt.err (!%p363_p9)
}
  0x3e   : > { %273 = dma.hbm_to_vmem [thread:$0]  (!%p529_p13), %s547_s16, 256, %s542_s12, %s107_s17  }
  0x3f   : > { %130 = sbr.rel (%p538_p1) target bundleno = 114 (0x72), region = 24  ;;  %s132_s9 = sand.u32 (!%p538_p1), 1, %s433_s20  }
  0x40   : > { %s252_s11 = sshll.u32 (!%p538_p1), %s132_s9, 4  ;;  %s133_s13 = scalar_lea.sflag (!%p538_p1), [#allocation5], %s132_s9 }
  0x41   : > { %s136_s14 = scalar_lea.vmem (!%p538_p1), [#allocation4], %s252_s11  ;;  %p636_p3 = scmp.ne.s32.totalorder (!%p538_p1), %s633_s28, 0 }
  0x46   : > { %420 = dma.done.wait (%p636_p3), %s133_s13, 256  }
  0x47   : > { %422 = vsyncadd (%p636_p3), %s133_s13, 4294967040  ;;  %p253_p8 = scmp.ne.s32.totalorder %s441_s22, 0 }
  0x48   : > { %v155_v0 = vld [vmem:[%s136_s14] sm:$0xff] (!%p253_p8)  ;;  %v156_v1 = vld [vmem:[%s136_s14 + $0x8] sm:$0xff] (!%p253_p8) }
  0x49   : > { %154 = sbr.rel (%p253_p8) target bundleno = 80 (0x50), region = 32  ;;  %157 = vst [vmem:[#allocation7] sm:$0xff] (!%p253_p8), %v155_v0  ;;  %158 = vst [vmem:[#allocation7 + $0x8] sm:$0xff] (!%p253_p8), %v156_v1 }
  0x50 PF: > { %p254_p13 = scmp.le.s32.totalorder %s441_s22, 0 }
  0x51   : > { %v163_v2 = vld [vmem:[#allocation7] sm:$0xff] (!%p254_p13)  ;;  %v164_v4 = vld [vmem:[#allocation7 + $0x8] sm:$0xff] (!%p254_p13) }
  0x52   : > { %162 = sbr.rel (%p254_p13) target bundleno = 89 (0x59), region = 36  ;;  %v165_v3 = vld [vmem:[%s136_s14] sm:$0xff] (!%p254_p13)  ;;  %v166_v6 = vld [vmem:[%s136_s14 + $0x8] sm:$0xff] (!%p254_p13) }
  0x53   : > { %v167_v5 = vadd.f32 (!%p254_p13), %v165_v3, %v163_v2  ;;  %v168_v7 = vadd.f32 (!%p254_p13), %v166_v6, %v164_v4 }
  0x55   : > { %169 = vst [vmem:[#allocation7] sm:$0xff] (!%p254_p13), %v167_v5  ;;  %170 = vst [vmem:[#allocation7 + $0x8] sm:$0xff] (!%p254_p13), %v168_v7 }
  0x59 PF: > { %p585_p1 = scmp.eq.s32.totalorder %s245_s25, 1  ;;  %s453_s5 = smov [#allocation7]  }
  0x5a   : > { %s181_s10 = sshll.u32 %s453_s5, 4  ;;  %s182_s10 = int_to_ptr.vmem [resolvable:$true] %s181_s10 }
  0x5b   : > { %s367_s22 = scalar_lea.vmem %s182_s10, 256  ;;  %p374_p12 = scmp.lt.s32.totalorder %s182_s10, %s182_s10 }
  0x5c   : > { %p368_p5 = scmp.ne.s32.totalorder %s182_s10, %s367_s22  ;;  %p375_p0 = scmp.lt.s32.totalorder %s367_s22, %s367_s22 }
  0x5e   : > { %p369_p10 = pnand %p368_p5, %p585_p1  ;;  %p376_p2 = por %p375_p0, %p374_p12 }
  0x60   : > { %p370_p11 = pneg %p369_p10 }
  0x62   : > { %p377_p4 = pnand %p376_p2, %p370_p11 }
  0x64   : > { %380 = shalt.err (!%p377_p4)
}
  0x65   : > { %s381_s25 = scalar_lea.hbm %s631_s2, 256 }
  0x66   : > { %p382_p6 = scmp.ne.s32.totalorder %s631_s2, %s381_s25  ;;  %p387_p3 = scmp.lt.u32.totalorder %s381_s25, %s631_s2 }
  0x68   : > { %p383_p7 = pnand %p382_p6, %p585_p1 }
  0x6a   : > { %p384_p9 = pneg %p383_p7 }
  0x6c   : > { %p389_p8 = pnand %p387_p3, %p384_p9 }
  0x6e   : > { %392 = shalt.err (!%p389_p8)
}
  0x6f   : > { %265 = dma.vmem_to_hbm [thread:$0]  (%p585_p1), %s182_s10, 256, %s631_s2, [#allocation6]  }
  0x70   : > { %424 = dma.done.wait (%p585_p1), [#allocation6], 256  }
  0x71   : > { %426 = vsyncadd (%p585_p1), [#allocation6], 4294967040 }
  0x72 PF: > { %s20_s24 = sadd.s32 1, %s449_s24   ;;  %s638_s19 = smov %s433_s20 }
  0x73   : > { %p17_p13 = scmp.ge.s32.totalorder %s20_s24, 4   ;;  %s639_s20 = smov %s437_s21 }
  0x74   : > { %s640_s21 = smov %s534_s7  ;;  %s641_s22 = smov %s445_s23 }
  0x75   : > { %s642_s23 = smov %s644_s0  ;;  %19 = sbr.rel (!%p17_p13) target bundleno = 17 (0x11), region = 70 }
  0x7c   :  { %194 = vsyncpa [#allocation5], 1 }
  0x7d   :  { %196 = vsyncpa [#allocation5 + $0x1], 1 }
  0x7e   :  { %197 = vsyncpa [#allocation6], 1 }
  0x7f   :  { %199 = vsyncpa [#allocation6 + $0x1], 1 }

</bundles_post_ra>
